<compile_context>
chip_gen: v7x
topology: tpu7x:2x2x1
jax: 0.10.0
libtpu: 0.0.40
codegen_flags: <defaults>
</compile_context>

<pallas_src>
import functools
import math

import jax
import jax.numpy as jnp
from jax.experimental import pallas as pl
from jax.experimental.pallas import tpu as pltpu


def _class_softmax(z):
    # Softmax over the class axis (axis 0).  Kept in f32 with an exact divide
    # because this path produces the returned `wei`.
    m = jnp.max(z, axis=0, keepdims=True)
    e = jnp.exp(z - m)
    return e / jnp.sum(e, axis=0, keepdims=True)


def _self_attn_kernel(wx_ref, dw_ref, b_ref,
                      wei_ref, m_out_ref, l_out_ref, acc_out_ref,
                      m_scr, l_scr, acc_scr, *, epw):
    # wx_ref     : (1, ncls, wh)      bf16, (w*W)@x, resident per batch (tiny)
    # dw_ref     : (1, wh, tile_j)    bf16, streamed spatial tile of diffW
    # b_ref      : (ncls, 1)          f32,  w*conv1.bias
    # wei_ref    : (1, ncls, tile_j)  f32,  "wei" output tile
    # m/l/acc_out: (1, 1, ncls, 1)    f32,  per-(batch, split) softmax state
    # m/l/acc_scr: (ncls, 1)          f32,  online spatial-softmax carry
    j = pl.program_id(2)
    last_j = pl.num_programs(2) - 1

    @pl.when(j == 0)
    def _init():
        m_scr[...] = jnp.full(m_scr.shape, -jnp.inf, dtype=jnp.float32)
        l_scr[...] = jnp.zeros(l_scr.shape, dtype=jnp.float32)
        acc_scr[...] = jnp.zeros(acc_scr.shape, dtype=jnp.float32)

    bias_s = b_ref[...]                                              # (ncls, 1)
    # Scaled logits for this spatial tile: w*conv1(x@diffW) = ((w*W)@x)@dw + w*b.
    logits_s = jnp.dot(wx_ref[0], dw_ref[0],
                       preferred_element_type=jnp.float32) + bias_s  # (ncls, tj)

    # softmax over classes (== self.softmax2(self.weight * out)), then again
    # inside weiPooling; the second one is the returned "wei".
    s1 = _class_softmax(logits_s)
    s2 = _class_softmax(s1)
    wei_ref[0] = s2

    # Online spatial softmax of s2 * exp(pool_w), accumulating the wsp-weighted
    # sum of (logits - bias), which is all that pred needs.
    z = s2 * epw                                                     # (ncls, tj)
    m_prev = m_scr[...]
    m_new = jnp.maximum(m_prev, jnp.max(z, axis=1, keepdims=True))
    alpha = jnp.exp(m_prev - m_new)
    p = jnp.exp(z - m_new)
    l_scr[...] = alpha * l_scr[...] + jnp.sum(p, axis=1, keepdims=True)
    acc_scr[...] = alpha * acc_scr[...] + jnp.sum(p * (logits_s - bias_s),
                                                  axis=1, keepdims=True)
    m_scr[...] = m_new

    @pl.when(j == last_j)
    def _finalize():
        # Emit the per-split online-softmax state; the (trivial) merge across
        # splits and the sigmoid prediction run in the wrapper epilogue.
        m_out_ref[0, 0] = m_scr[...]
        l_out_ref[0, 0] = l_scr[...]
        acc_out_ref[0, 0] = acc_scr[...]


def _vmem_capacity_bytes():
    """Physical per-core VMEM; conservative 64 MiB fallback if the query fails."""
    try:
        return int(pltpu.get_tpu_info().vmem_capacity_bytes)
    except Exception:
        return 64 * 1024 * 1024


def _pick_tile_j(wh, vmem_limit_bytes, ncls):
    """Largest spatial tile (multiple of 128 dividing wh) whose double-buffered
    bf16 diffW slab fits the scoped-VMEM budget."""
    if wh % 128 != 0:
        return wh
    # Non-diffW VMEM users: double-buffered wx input (bf16) + wei output tile
    # (f32, <= wh lanes) + scalar state/scratch + compiler headroom.
    reserve = 6 * 2**20 + 2 * ncls * wh * (2 + 4)
    budget = max(vmem_limit_bytes - reserve, vmem_limit_bytes // 4)
    t_max = min(wh, (budget // (2 * wh * 2) // 128) * 128)
    t = t_max
    while t >= 128:
        if wh % t == 0:
            return t
        t -= 128
    return 128


def self_attention_module_v2(x, diffW, conv_w, conv_b,
                             w_scalar=5.0, pool_w=5.0,
                             tile_j=None, n_split=None):
    """Forward pass of SelfAttention_Module_v2 (n_stride == 1).

    x: (bs, d, w, h) NCHW features; diffW: (bs, w*h, w*h); conv_w: (ncls, d)
    1x1-conv weight; conv_b: (ncls,) bias.
    Returns (out, wei): out (bs, 1, ncls), wei (bs, ncls, w*h).
    """
    bs, d, w, h = x.shape
    wh = w * h
    ncls = conv_w.shape[0]
    assert diffW.shape == (bs, wh, wh)

    # ---- generation-aware VMEM budget & spatial tile ------------------------
    vmem_cap = _vmem_capacity_bytes()
    if vmem_cap >= 100 * 2**20:            # v5e / v6e: 128 MiB physical VMEM
        vmem_limit = 110 * 2**20
    else:                                  # v7x: 64 MiB per TensorCore
        vmem_limit = min(52 * 2**20, max(int(vmem_cap * 0.8), 16 * 2**20))

    if tile_j is None:
        tile_j = _pick_tile_j(wh, vmem_limit, ncls)
    assert wh % tile_j == 0 and (tile_j == wh or tile_j % 128 == 0)
    num_j_total = wh // tile_j

    # Split the spatial stream across a second "parallel" grid axis when the
    # batch alone cannot keep both v7x TensorCores busy.  Harmless on
    # single-core chips: total work is unchanged; only the tiny softmax-state
    # merge moves into the wrapper epilogue.
    if n_split is None:
        n_split = 2 if (bs == 1 and num_j_total >= 2 and num_j_total % 2 == 0) else 1
    assert num_j_total % n_split == 0
    num_j = num_j_total // n_split

    # ---- hoisted per-batch matmul (frees ~32 MiB of VMEM at real shapes) ----
    # wx = (w * conv1.weight) @ x : (bs, ncls, wh); bf16 inputs, f32 MXU
    # accumulation, stored bf16 for the in-kernel matmul against bf16 diffW.
    # TODO(synk): keep wx in f32 if tolerances ever tighten; it is free under
    #             the diffW HBM roofline.
    x_bf = x.reshape(bs, d, wh).astype(jnp.bfloat16)
    w_bf = (w_scalar * conv_w).astype(jnp.bfloat16)
    wx = jnp.einsum('cd,bdk->bck', w_bf, x_bf,
                    preferred_element_type=jnp.float32).astype(jnp.bfloat16)
    dw = diffW.astype(jnp.bfloat16)
    b_s = (w_scalar * conv_b).reshape(ncls, 1).astype(jnp.float32)
    epw = float(math.exp(pool_w))          # exp(weiPooling.weights), static

    # ---- diffW buffering depth ----------------------------------------------
    dw_tile_bytes = wh * tile_j * 2
    reserve = 6 * 2**20 + 2 * ncls * wh * (2 + 4)
    dw_bufs = 2
    if (vmem_cap >= 100 * 2**20                      # big-VMEM parts only
            and bs * n_split * num_j >= 3            # enough tiles to stream
            and 3 * dw_tile_bytes + reserve <= vmem_limit):
        dw_bufs = 3

    dw_index = lambda b, c, j: (b, 0, c * num_j + j)
    if dw_bufs == 2:
        dw_spec = pl.BlockSpec((1, wh, tile_j), dw_index)
    else:
        dw_spec = pl.BlockSpec((1, wh, tile_j), dw_index,
                               pipeline_mode=pl.Buffered(dw_bufs))

    kernel = functools.partial(_self_attn_kernel, epw=epw)

    wei, m_st, l_st, acc_st = pl.pallas_call(
        kernel,
        out_shape=(
            jax.ShapeDtypeStruct((bs, ncls, wh), jnp.float32),
            jax.ShapeDtypeStruct((bs, n_split, ncls, 1), jnp.float32),
            jax.ShapeDtypeStruct((bs, n_split, ncls, 1), jnp.float32),
            jax.ShapeDtypeStruct((bs, n_split, ncls, 1), jnp.float32),
        ),
        grid_spec=pltpu.PrefetchScalarGridSpec(
            num_scalar_prefetch=0,
            grid=(bs, n_split, num_j),
            in_specs=[
                pl.BlockSpec((1, ncls, wh), lambda b, c, j: (b, 0, 0)),   # wx (tiny, per-batch)
                dw_spec,                                                  # diffW spatial tile
                pl.BlockSpec((ncls, 1), lambda b, c, j: (0, 0)),          # w*conv1.bias
            ],
            out_specs=[
                pl.BlockSpec((1, ncls, tile_j),
                             lambda b, c, j: (b, 0, c * num_j + j)),      # wei tile
                pl.BlockSpec((1, 1, ncls, 1), lambda b, c, j: (b, c, 0, 0)),  # m state
                pl.BlockSpec((1, 1, ncls, 1), lambda b, c, j: (b, c, 0, 0)),  # l state
                pl.BlockSpec((1, 1, ncls, 1), lambda b, c, j: (b, c, 0, 0)),  # acc state
            ],
            scratch_shapes=[
                pltpu.VMEM((ncls, 1), jnp.float32),    # running max
                pltpu.VMEM((ncls, 1), jnp.float32),    # running denominator
                pltpu.VMEM((ncls, 1), jnp.float32),    # running weighted sum
            ],
        ),
        compiler_params=pltpu.CompilerParams(
            dimension_semantics=("parallel", "parallel", "arbitrary"),
            vmem_limit_bytes=vmem_limit,
        ),
    )(wx, dw, b_s)

    # ---- merge per-split online-softmax state + prediction epilogue ---------
    m = m_st[..., 0]                          # (bs, n_split, ncls)
    l = l_st[..., 0]
    acc = acc_st[..., 0]
    m_star = jnp.max(m, axis=1, keepdims=True)
    scale = jnp.exp(m - m_star)
    l_tot = jnp.sum(scale * l, axis=1)        # (bs, ncls)
    acc_tot = jnp.sum(scale * acc, axis=1)    # (bs, ncls)
    bias_s = (w_scalar * conv_b).astype(jnp.float32)[None, :]
    # sigmoid(w*pred) == sigmoid(sum_j wsp*(w*logits - w*b) + w*b) == sigmoid(acc/l + w*b)
    pred_s = acc_tot / l_tot + bias_s
    out = jax.nn.sigmoid(pred_s).reshape(bs, 1, ncls)
    return out, wei


def _reference(x, diffW, conv_w, conv_b, w_scalar=5.0, pool_w=5.0):
    """Pure-JAX reference following the original PyTorch op order.  Inputs are
    rounded to bf16 to mirror the kernel's deliberate bf16-input choice; the
    reassociation / pred-rewrite / online-softmax deltas are covered by the
    comparison tolerances."""
    bs, d, w, h = x.shape
    wh = w * h
    xf = x.reshape(bs, d, wh).astype(jnp.bfloat16).astype(jnp.float32)
    dw = diffW.astype(jnp.bfloat16).astype(jnp.float32)
    W = conv_w.astype(jnp.bfloat16).astype(jnp.float32)
    b = conv_b.astype(jnp.float32)
    out_diff = jnp.einsum('bdk,bkj->bdj', xf, dw)
    logits = jnp.einsum('cd,bdj->bcj', W, out_diff) + b[None, :, None]
    s1 = jax.nn.softmax(w_scalar * logits, axis=1)
    s2 = jax.nn.softmax(s1, axis=1)
    wsp = jax.nn.softmax(s2 * jnp.exp(pool_w), axis=2)
    pooled = jnp.einsum('bcj,bdj->bcd', wsp, out_diff)
    pred = jnp.sum(pooled * W[None], axis=2) + b[None]
    out = jax.nn.sigmoid(w_scalar * pred).reshape(bs, 1, -1)
    return out, s2


if __name__ == "__main__":
    bs, d, w, h = 2, 64, 16, 16     # d stands in for the module's 2048 channels
    ncls = 4
    wh = w * h

    key = jax.random.PRNGKey(0)
    k1, k2, k3, k4 = jax.random.split(key, 4)

    x = jax.random.normal(k1, (bs, d, w, h), dtype=jnp.float32)
    diffW_raw = jax.random.uniform(k2, (bs, wh, wh), dtype=jnp.float32)
    # row-normalize so it resembles a diffusion/transition matrix
    diffW = diffW_raw / jnp.sum(diffW_raw, axis=2, keepdims=True)

    # conv1.weight ~ N(0, 0.01), bias small
    conv_w = 0.01 * jax.random.normal(k3, (ncls, d), dtype=jnp.float32)
    conv_b = 0.05 * jax.random.normal(k4, (ncls,), dtype=jnp.float32)

    ref_out, ref_wei = _reference(x, diffW, conv_w, conv_b)

    # 1) batch-parallel path; tile_j=128 -> 2 spatial tiles, so the online
    #    spatial softmax carry is exercised.
    out, wei = self_attention_module_v2(x, diffW, conv_w, conv_b, tile_j=128)
    out = jax.block_until_ready(out)
    wei = jax.block_until_ready(wei)
    assert out.shape == (bs, 1, ncls)
    assert wei.shape == (bs, ncls, wh)
    assert jnp.allclose(wei, ref_wei, rtol=2e-3, atol=3e-4), \
        float(jnp.max(jnp.abs(wei - ref_wei)))
    assert jnp.allclose(out, ref_out, rtol=2e-3, atol=1e-3), \
        float(jnp.max(jnp.abs(out - ref_out)))

    # 2) bs==1 path with the spatial axis split across two "parallel" grid
    #    entries (dual-TC v7x layout) and the softmax-state merge in the wrapper.
    out1, wei1 = self_attention_module_v2(x[:1], diffW[:1], conv_w, conv_b,
                                          tile_j=128, n_split=2)
    out1 = jax.block_until_ready(out1)
    wei1 = jax.block_until_ready(wei1)
    assert out1.shape == (1, 1, ncls)
    assert wei1.shape == (1, ncls, wh)
    assert jnp.allclose(wei1, ref_wei[:1], rtol=2e-3, atol=3e-4), \
        float(jnp.max(jnp.abs(wei1 - ref_wei[:1])))
    assert jnp.allclose(out1, ref_out[:1], rtol=2e-3, atol=1e-3), \
        float(jnp.max(jnp.abs(out1 - ref_out[:1])))

    print("KERNEL_OK")
</pallas_src>

<mosaic_0001>
module attributes {stable_mosaic.version = 11 : i64} {
  func.func @_self_attn_kernel(%arg0: i32, %arg1: i32, %arg2: i32, %arg3: memref<1x4x256xbf16, #tpu.memory_space<vmem>>, %arg4: memref<1x256x128xbf16, #tpu.memory_space<vmem>>, %arg5: memref<4x1xf32, #tpu.memory_space<vmem>>, %arg6: memref<1x4x128xf32, #tpu.memory_space<vmem>>, %arg7: memref<1x1x4x1xf32, #tpu.memory_space<vmem>>, %arg8: memref<1x1x4x1xf32, #tpu.memory_space<vmem>>, %arg9: memref<1x1x4x1xf32, #tpu.memory_space<vmem>>, %arg10: memref<4x1xf32, #tpu.memory_space<vmem>>, %arg11: memref<4x1xf32, #tpu.memory_space<vmem>>, %arg12: memref<4x1xf32, #tpu.memory_space<vmem>>) attributes {dimension_semantics = [#tpu.dimension_semantics<parallel>, #tpu.dimension_semantics<parallel>, #tpu.dimension_semantics<arbitrary>], iteration_bounds = array<i64: 2, 1, 2>, scalar_prefetch = 0 : i64, scratch_operands = 3 : i64, tpu.core_type = #tpu.core_type<tc>, window_params = [{transform_indices = @transform_0, window_bounds = array<i64: 1, 4, 256>}, {transform_indices = @transform_1, window_bounds = array<i64: 1, 256, 128>}, {pipeline_mode = #tpu.pipeline_mode<synchronous>, transform_indices = @transform_2, window_bounds = array<i64: 4, 1>}, {transform_indices = @transform_3, window_bounds = array<i64: 1, 4, 128>}, {transform_indices = @transform_4, window_bounds = array<i64: 1, 1, 4, 1>}, {transform_indices = @transform_5, window_bounds = array<i64: 1, 1, 4, 1>}, {transform_indices = @transform_6, window_bounds = array<i64: 1, 1, 4, 1>}]} {
    %c0_i32 = arith.constant 0 : i32
    %0 = arith.cmpi eq, %arg2, %c0_i32 : i32
    %1 = arith.extui %0 : i1 to i32
    %c0_i32_0 = arith.constant 0 : i32
    %2 = arith.cmpi ne, %1, %c0_i32_0 : i32
    scf.if %2 {
      %cst_32 = arith.constant 0xFF800000 : f32
      %62 = vector.broadcast %cst_32 : f32 to vector<4x1xf32>
      %c0_33 = arith.constant 0 : index
      %c0_34 = arith.constant 0 : index
      %63 = vector.load %arg10[%c0_33, %c0_34] : memref<4x1xf32, #tpu.memory_space<vmem>>, vector<4x1xf32>
      tpu.vector_store %arg10[%c0_33, %c0_34], %62 {strides = array<i32>} : memref<4x1xf32, #tpu.memory_space<vmem>>, vector<4x1xf32>,
      %cst_35 = arith.constant 0.000000e+00 : f32
      %64 = vector.broadcast %cst_35 : f32 to vector<4x1xf32>
      %c0_36 = arith.constant 0 : index
      %c0_37 = arith.constant 0 : index
      %65 = vector.load %arg11[%c0_36, %c0_37] : memref<4x1xf32, #tpu.memory_space<vmem>>, vector<4x1xf32>
      tpu.vector_store %arg11[%c0_36, %c0_37], %64 {strides = array<i32>} : memref<4x1xf32, #tpu.memory_space<vmem>>, vector<4x1xf32>,
      %cst_38 = arith.constant 0.000000e+00 : f32
      %66 = vector.broadcast %cst_38 : f32 to vector<4x1xf32>
      %c0_39 = arith.constant 0 : index
      %c0_40 = arith.constant 0 : index
      %67 = vector.load %arg12[%c0_39, %c0_40] : memref<4x1xf32, #tpu.memory_space<vmem>>, vector<4x1xf32>
      tpu.vector_store %arg12[%c0_39, %c0_40], %66 {strides = array<i32>} : memref<4x1xf32, #tpu.memory_space<vmem>>, vector<4x1xf32>,
    } else {
    }
    %c0 = arith.constant 0 : index
    %c0_1 = arith.constant 0 : index
    %3 = vector.load %arg5[%c0, %c0_1] : memref<4x1xf32, #tpu.memory_space<vmem>>, vector<4x1xf32>
    %c0_2 = arith.constant 0 : index
    %c0_3 = arith.constant 0 : index
    %c0_4 = arith.constant 0 : index
    %4 = vector.load %arg3[%c0_2, %c0_3, %c0_4] : memref<1x4x256xbf16, #tpu.memory_space<vmem>>, vector<1x4x256xbf16>
    %5 = vector.shape_cast %4 : vector<1x4x256xbf16> to vector<4x256xbf16>
    %c0_5 = arith.constant 0 : index
    %c0_6 = arith.constant 0 : index
    %c0_7 = arith.constant 0 : index
    %6 = vector.load %arg4[%c0_5, %c0_6, %c0_7] : memref<1x256x128xbf16, #tpu.memory_space<vmem>>, vector<1x256x128xbf16>
    %7 = vector.shape_cast %6 : vector<1x256x128xbf16> to vector<256x128xbf16>
    %cst = arith.constant dense<0.000000e+00> : vector<4x128xf32>
    %8 = tpu.matmul %5, %7, %cst {dimension_numbers = #tpu.dot_dimension_numbers<[1], [0], [0], [1], [0, 0, 1, 1], [], []>} : vector<4x256xbf16>, vector<256x128xbf16>, vector<4x128xf32> -> vector<4x128xf32>
    %9 = vector.broadcast %3 : vector<4x1xf32> to vector<4x128xf32>
    %10 = arith.addf %8, %9 : vector<4x128xf32>
    %cst_8 = arith.constant dense<0xFF800000> : vector<128xf32>
    %11 = vector.multi_reduction <maximumf>, %10, %cst_8 [0] : vector<4x128xf32> to vector<128xf32>
    %12 = vector.shape_cast %11 : vector<128xf32> to vector<1x128xf32>
    %13 = vector.broadcast %12 : vector<1x128xf32> to vector<4x128xf32>
    %14 = arith.subf %10, %13 : vector<4x128xf32>
    %15 = math.exp %14 : vector<4x128xf32>
    %cst_9 = arith.constant dense<0.000000e+00> : vector<128xf32>
    %16 = vector.multi_reduction <add>, %15, %cst_9 [0] : vector<4x128xf32> to vector<128xf32>
    %17 = vector.shape_cast %16 : vector<128xf32> to vector<1x128xf32>
    %18 = vector.broadcast %17 : vector<1x128xf32> to vector<4x128xf32>
    %19 = arith.divf %15, %18 : vector<4x128xf32>
    %cst_10 = arith.constant dense<0xFF800000> : vector<128xf32>
    %20 = vector.multi_reduction <maximumf>, %19, %cst_10 [0] : vector<4x128xf32> to vector<128xf32>
    %21 = vector.shape_cast %20 : vector<128xf32> to vector<1x128xf32>
    %22 = vector.broadcast %21 : vector<1x128xf32> to vector<4x128xf32>
    %23 = arith.subf %19, %22 : vector<4x128xf32>
    %24 = math.exp %23 : vector<4x128xf32>
    %cst_11 = arith.constant dense<0.000000e+00> : vector<128xf32>
    %25 = vector.multi_reduction <add>, %24, %cst_11 [0] : vector<4x128xf32> to vector<128xf32>
    %26 = vector.shape_cast %25 : vector<128xf32> to vector<1x128xf32>
    %27 = vector.broadcast %26 : vector<1x128xf32> to vector<4x128xf32>
    %28 = arith.divf %24, %27 : vector<4x128xf32>
    %c0_12 = arith.constant 0 : index
    %c0_13 = arith.constant 0 : index
    %c0_14 = arith.constant 0 : index
    %29 = vector.load %arg6[%c0_12, %c0_13, %c0_14] : memref<1x4x128xf32, #tpu.memory_space<vmem>>, vector<1x4x128xf32>
    %30 = vector.shape_cast %29 : vector<1x4x128xf32> to vector<4x128xf32>
    %31 = vector.shape_cast %28 : vector<4x128xf32> to vector<1x4x128xf32>
    tpu.vector_store %arg6[%c0_12, %c0_13, %c0_14], %31 {strides = array<i32>} : memref<1x4x128xf32, #tpu.memory_space<vmem>>, vector<1x4x128xf32>,
    %cst_15 = arith.constant 148.413162 : f32
    %32 = vector.broadcast %cst_15 : f32 to vector<4x128xf32>
    %33 = arith.mulf %28, %32 : vector<4x128xf32>
    %c0_16 = arith.constant 0 : index
    %c0_17 = arith.constant 0 : index
    %34 = vector.load %arg10[%c0_16, %c0_17] : memref<4x1xf32, #tpu.memory_space<vmem>>, vector<4x1xf32>
    %cst_18 = arith.constant dense<0xFF800000> : vector<4xf32>
    %35 = vector.multi_reduction <maximumf>, %33, %cst_18 [1] : vector<4x128xf32> to vector<4xf32>
    %36 = vector.shape_cast %35 : vector<4xf32> to vector<4x1xf32>
    %37 = arith.maximumf %34, %36 : vector<4x1xf32>
    %38 = arith.subf %34, %37 : vector<4x1xf32>
    %39 = math.exp %38 : vector<4x1xf32>
    %40 = vector.broadcast %37 : vector<4x1xf32> to vector<4x128xf32>
    %41 = arith.subf %33, %40 : vector<4x128xf32>
    %42 = math.exp %41 : vector<4x128xf32>
    %c0_19 = arith.constant 0 : index
    %c0_20 = arith.constant 0 : index
    %43 = vector.load %arg11[%c0_19, %c0_20] : memref<4x1xf32, #tpu.memory_space<vmem>>, vector<4x1xf32>
    %44 = arith.mulf %39, %43 : vector<4x1xf32>
    %cst_21 = arith.constant dense<0.000000e+00> : vector<4xf32>
    %45 = vector.multi_reduction <add>, %42, %cst_21 [1] : vector<4x128xf32> to vector<4xf32>
    %46 = vector.shape_cast %45 : vector<4xf32> to vector<4x1xf32>
    %47 = arith.addf %44, %46 : vector<4x1xf32>
    %c0_22 = arith.constant 0 : index
    %c0_23 = arith.constant 0 : index
    %48 = vector.load %arg11[%c0_22, %c0_23] : memref<4x1xf32, #tpu.memory_space<vmem>>, vector<4x1xf32>
    tpu.vector_store %arg11[%c0_22, %c0_23], %47 {strides = array<i32>} : memref<4x1xf32, #tpu.memory_space<vmem>>, vector<4x1xf32>,
    %c0_24 = arith.constant 0 : index
    %c0_25 = arith.constant 0 : index
    %49 = vector.load %arg12[%c0_24, %c0_25] : memref<4x1xf32, #tpu.memory_space<vmem>>, vector<4x1xf32>
    %50 = arith.mulf %39, %49 : vector<4x1xf32>
    %51 = vector.broadcast %3 : vector<4x1xf32> to vector<4x128xf32>
    %52 = arith.subf %10, %51 : vector<4x128xf32>
    %53 = arith.mulf %42, %52 : vector<4x128xf32>
    %cst_26 = arith.constant dense<0.000000e+00> : vector<4xf32>
    %54 = vector.multi_reduction <add>, %53, %cst_26 [1] : vector<4x128xf32> to vector<4xf32>
    %55 = vector.shape_cast %54 : vector<4xf32> to vector<4x1xf32>
    %56 = arith.addf %50, %55 : vector<4x1xf32>
    %c0_27 = arith.constant 0 : index
    %c0_28 = arith.constant 0 : index
    %57 = vector.load %arg12[%c0_27, %c0_28] : memref<4x1xf32, #tpu.memory_space<vmem>>, vector<4x1xf32>
    tpu.vector_store %arg12[%c0_27, %c0_28], %56 {strides = array<i32>} : memref<4x1xf32, #tpu.memory_space<vmem>>, vector<4x1xf32>,
    %c0_29 = arith.constant 0 : index
    %c0_30 = arith.constant 0 : index
    %58 = vector.load %arg10[%c0_29, %c0_30] : memref<4x1xf32, #tpu.memory_space<vmem>>, vector<4x1xf32>
    tpu.vector_store %arg10[%c0_29, %c0_30], %37 {strides = array<i32>} : memref<4x1xf32, #tpu.memory_space<vmem>>, vector<4x1xf32>,
    %c1_i32 = arith.constant 1 : i32
    %59 = arith.cmpi eq, %arg2, %c1_i32 : i32
    %60 = arith.extui %59 : i1 to i32
    %c0_i32_31 = arith.constant 0 : i32
    %61 = arith.cmpi ne, %60, %c0_i32_31 : i32
    scf.if %61 {
      %c0_32 = arith.constant 0 : index
      %c0_33 = arith.constant 0 : index
      %62 = vector.load %arg10[%c0_32, %c0_33] : memref<4x1xf32, #tpu.memory_space<vmem>>, vector<4x1xf32>
      %c0_34 = arith.constant 0 : index
      %c0_35 = arith.constant 0 : index
      %c0_36 = arith.constant 0 : index
      %c0_37 = arith.constant 0 : index
      %63 = vector.load %arg7[%c0_34, %c0_35, %c0_36, %c0_37] : memref<1x1x4x1xf32, #tpu.memory_space<vmem>>, vector<1x1x4x1xf32>
      %64 = vector.shape_cast %63 : vector<1x1x4x1xf32> to vector<4x1xf32>
      %65 = vector.shape_cast %62 : vector<4x1xf32> to vector<1x1x4x1xf32>
      tpu.vector_store %arg7[%c0_34, %c0_35, %c0_36, %c0_37], %65 {strides = array<i32>} : memref<1x1x4x1xf32, #tpu.memory_space<vmem>>, vector<1x1x4x1xf32>,
      %c0_38 = arith.constant 0 : index
      %c0_39 = arith.constant 0 : index
      %66 = vector.load %arg11[%c0_38, %c0_39] : memref<4x1xf32, #tpu.memory_space<vmem>>, vector<4x1xf32>
      %c0_40 = arith.constant 0 : index
      %c0_41 = arith.constant 0 : index
      %c0_42 = arith.constant 0 : index
      %c0_43 = arith.constant 0 : index
      %67 = vector.load %arg8[%c0_40, %c0_41, %c0_42, %c0_43] : memref<1x1x4x1xf32, #tpu.memory_space<vmem>>, vector<1x1x4x1xf32>
      %68 = vector.shape_cast %67 : vector<1x1x4x1xf32> to vector<4x1xf32>
      %69 = vector.shape_cast %66 : vector<4x1xf32> to vector<1x1x4x1xf32>
      tpu.vector_store %arg8[%c0_40, %c0_41, %c0_42, %c0_43], %69 {strides = array<i32>} : memref<1x1x4x1xf32, #tpu.memory_space<vmem>>, vector<1x1x4x1xf32>,
      %c0_44 = arith.constant 0 : index
      %c0_45 = arith.constant 0 : index
      %70 = vector.load %arg12[%c0_44, %c0_45] : memref<4x1xf32, #tpu.memory_space<vmem>>, vector<4x1xf32>
      %c0_46 = arith.constant 0 : index
      %c0_47 = arith.constant 0 : index
      %c0_48 = arith.constant 0 : index
      %c0_49 = arith.constant 0 : index
      %71 = vector.load %arg9[%c0_46, %c0_47, %c0_48, %c0_49] : memref<1x1x4x1xf32, #tpu.memory_space<vmem>>, vector<1x1x4x1xf32>
      %72 = vector.shape_cast %71 : vector<1x1x4x1xf32> to vector<4x1xf32>
      %73 = vector.shape_cast %70 : vector<4x1xf32> to vector<1x1x4x1xf32>
      tpu.vector_store %arg9[%c0_46, %c0_47, %c0_48, %c0_49], %73 {strides = array<i32>} : memref<1x1x4x1xf32, #tpu.memory_space<vmem>>, vector<1x1x4x1xf32>,
    } else {
    }
    return
  }
  func.func @transform_0(%arg0: i32, %arg1: i32, %arg2: i32) -> (i32, i32, i32) {
    %c0_i32 = arith.constant 0 : i32
    %c0_i32_0 = arith.constant 0 : i32
    %c0_i32_1 = arith.constant 0 : i32
    return %arg0, %c0_i32, %c0_i32_0 : i32, i32, i32
  }
  func.func @transform_1(%arg0: i32, %arg1: i32, %arg2: i32) -> (i32, i32, i32) {
    %c2_i32 = arith.constant 2 : i32
    %0 = arith.muli %arg1, %c2_i32 : i32
    %1 = arith.addi %0, %arg2 : i32
    %c0_i32 = arith.constant 0 : i32
    %c0_i32_0 = arith.constant 0 : i32
    return %arg0, %c0_i32, %1 : i32, i32, i32
  }
  func.func @transform_2(%arg0: i32, %arg1: i32, %arg2: i32) -> (i32, i32) {
    %c0_i32 = arith.constant 0 : i32
    %c0_i32_0 = arith.constant 0 : i32
    %c0_i32_1 = arith.constant 0 : i32
    return %c0_i32, %c0_i32_0 : i32, i32
  }
  func.func @transform_3(%arg0: i32, %arg1: i32, %arg2: i32) -> (i32, i32, i32) {
    %c2_i32 = arith.constant 2 : i32
    %0 = arith.muli %arg1, %c2_i32 : i32
    %1 = arith.addi %0, %arg2 : i32
    %c0_i32 = arith.constant 0 : i32
    %c0_i32_0 = arith.constant 0 : i32
    return %arg0, %c0_i32, %1 : i32, i32, i32
  }
  func.func @transform_4(%arg0: i32, %arg1: i32, %arg2: i32) -> (i32, i32, i32, i32) {
    %c0_i32 = arith.constant 0 : i32
    %c0_i32_0 = arith.constant 0 : i32
    %c0_i32_1 = arith.constant 0 : i32
    return %arg0, %arg1, %c0_i32, %c0_i32_0 : i32, i32, i32, i32
  }
  func.func @transform_5(%arg0: i32, %arg1: i32, %arg2: i32) -> (i32, i32, i32, i32) {
    %c0_i32 = arith.constant 0 : i32
    %c0_i32_0 = arith.constant 0 : i32
    %c0_i32_1 = arith.constant 0 : i32
    return %arg0, %arg1, %c0_i32, %c0_i32_0 : i32, i32, i32, i32
  }
  func.func @transform_6(%arg0: i32, %arg1: i32, %arg2: i32) -> (i32, i32, i32, i32) {
    %c0_i32 = arith.constant 0 : i32
    %c0_i32_0 = arith.constant 0 : i32
    %c0_i32_1 = arith.constant 0 : i32
    return %arg0, %arg1, %c0_i32, %c0_i32_0 : i32, i32, i32, i32
  }
}

</mosaic_0001>

<bundles_post_ra>
// kernel: tpu_custom_call.1
= control target key start
LH: loop header
LB: loop body
LE: loop exit
PB: predicated region body
PF: predicated region fallthrough
CT: control target
= control target key end

     0   :  { %12 = vsyncpa [#allocation6], 0  ;;  %s1747_s0 = inlined_call_operand.hbm [shape: bf16[2,4,256], index: 0, kind: input, shape index: {}]   ;;  %s1748_s1 = inlined_call_operand.hbm [shape: bf16[2,256,256], index: 1, kind: input, shape index: {}]   ;;  %s1749_s2 = inlined_call_operand.vmem [shape: f32[4,1], index: 2, kind: input, shape index: {}]   ;;  %s1750_s3 = inlined_call_operand.hbm [shape: f32[2,4,256], index: 3, kind: output, shape index: {0}]   ;;  %s1751_s4 = inlined_call_operand.vmem [shape: f32[2,1,4,1], index: 4, kind: output, shape index: {1}]   ;;  %s1752_s5 = inlined_call_operand.vmem [shape: f32[2,1,4,1], index: 5, kind: output, shape index: {2}]   ;;  %s1753_s6 = inlined_call_operand.vmem [shape: f32[2,1,4,1], index: 6, kind: output, shape index: {3}]  }
   0x1   :  { %14 = vsyncpa [#allocation6 + $0x1], 0 }
   0x2   :  { %15 = vsyncpa [#allocation9], 0 }
   0x3   :  { %17 = vsyncpa [#allocation9 + $0x1], 0 }
   0x4   :  { %18 = vsyncpa [#allocation7], 0 }
   0x5   :  { %20 = vsyncpa [#allocation7 + $0x1], 0  ;;  %s1376_s21 = smov 0   ;;  %s1378_s22 = smov 0  }
   0x6   :  { %s1380_s23 = smov 0   ;;  %s1382_s24 = smov 0  }
   0x7   :  { %s1384_s25 = smov 0   ;;  %s1386_s26 = smov 0  }
   0x8   :  { %s1388_s27 = smov 0   ;;  %s1390_s28 = smov 0  }
   0x9   :  { %s1392_s29 = smov 0   ;;  %s1394_s30 = smov 0  }
   0xa   :  { %s1396_s7 = smov 0  }
   0xb LB: > { %1763 = sst [smem:[#allocation14_spill]] %s1290_s21  ;;  %s937_s8 = sadd.s32 4294967295, %s1330_s7   ;;  %s1330_s7 = sphi %s1396_s7, %s26_s7   ;;  %s1326_s30 = sphi %s1394_s30, %s1793_s30   ;;  %s1322_s29 = sphi %s1392_s29, %s1792_s29   ;;  %s1318_s28 = sphi %s1390_s28, %s1791_s28   ;;  %s1314_s27 = sphi %s1388_s27, %s1790_s27   ;;  %s1310_s26 = sphi %s1386_s26, %s1789_s26   ;;  %s1306_s25 = sphi %s1384_s25, %s1798_s25   ;;  %s1302_s24 = sphi %s1382_s24, %s1797_s24   ;;  %s1298_s23 = sphi %s1380_s23, %s1796_s23   ;;  %s1294_s22 = sphi %s1378_s22, %s1795_s22   ;;  %s1290_s21 = sphi %s1376_s21, %s1794_s21  }
   0xc   : > { %1764 = sst [smem:[#allocation15_spill]] %s1310_s26  ;;  %s938_s9 = sadd.s32 4294967294, %s1330_s7  }
   0xd   : > { %1765 = sst [smem:[#allocation16_spill]] %s1322_s29  ;;  %s38_s10 = sadd.s32 1, %s1322_s29 }
   0xe   : > { %1766 = sst [smem:[#allocation17_spill]] %s1326_s30  ;;  %s45_s11 = sadd.s32 1, %s1326_s30 }
   0xf   : > { %p39_p0 = scmp.ge.s32.totalorder %s38_s10, 2  ;;  %s52_s12 = sadd.s32 1, %s1310_s26 }
  0x10   : > { %p59_p1 = scmp.ne.s32.totalorder %s1310_s26, %s1306_s25  ;;  %p60_p2 = scmp.eq.s32.totalorder %s1330_s7, 0 }
  0x11   : > { %s1800_s10 = smov (%p39_p0, %s38_s10), 0  ;;  %s1802_s11 = smov (!%p39_p0, %s45_s11), %s1326_s30 }
  0x12   : > { %1767 = sst [smem:[#allocation18_spill]] %s1800_s10  ;;  %p1442_p3 = por %p60_p2, %p59_p1 }
  0x13   : > { %p65_p4 = scmp.ne.s32.totalorder %s1306_s25, %s1302_s24  ;;  %p47_p5 = scmp.ge.s32.totalorder %s1802_s11, 2 }
  0x14   : > { %p1447_p6 = scmp.eq.s32.totalorder %s937_s8, 0  ;;  %s80_s15 = ssub.s32 %s1322_s29, %s1800_s10 }
  0x15   : > { %s84_s16 = sadd.s32 1, %s1298_s23  ;;  %s1804_s11 = smov (%p47_p5, %s1802_s11), 0 }
  0x16   : > { %1770 = sst [smem:[#allocation19_spill]] %s1804_s11  ;;  %p1458_p7 = por %p1447_p6, %p65_p4 }
  0x17   : > { %p91_p8 = scmp.ne.s32.totalorder %s1298_s23, %s1294_s22  ;;  %s49_s18 = ssub.s32 %s1326_s30, %s1804_s11 }
  0x18   : > { %s1771_s17 = scalar_select %p1458_p7, 1, 0 }
  0x19   : > { %p97_p9 = scmp.ne.s32.totalorder %s1294_s22, %s1290_s21  ;;  %p50_p10 = scmp.eq.s32.totalorder %s49_s18, 0 }
  0x1a   : > { %s81_s19 = sor.u32 %s80_s15, %s49_s18  ;;  %p1470_p12 = por %p91_p8, %p60_p2 }
  0x1b   : > { %p82_p11 = scmp.eq.s32.totalorder %s81_s19, 0  ;;  %p1482_p13 = por %p97_p9, %p1447_p6 }
  0x1c   : > { %s1475_s24 = scalar_select %p50_p10, %s1310_s26, %s52_s12  }
  0x1d   : > { %s1478_s10 = scalar_select %p82_p11, %s1298_s23, %s84_s16  }
  0x1e   : > { %1773 = sst [smem:[#allocation20_spill]] %s1475_s24  ;;  %p148_p0 = scmp.eq.s32.totalorder %s937_s8, 3 }
  0x1f   : > { %1774 = sst [smem:[#allocation21_spill]] %s1478_s10  ;;  %p154_p1 = scmp.eq.s32.totalorder %s938_s9, 3 }
  0x20   : > { %s1775_s11 = scalar_select %p1482_p13, 1, 0 }
  0x21   : > { %p1486_p4 = por %p148_p0, %p91_p8  ;;  %p1018_p2 = scmp.lt.s32.totalorder %s1330_s7, 4 }
  0x22   : > { %p1491_p5 = por %p154_p1, %p97_p9  ;;  %s261_s12 = sand.u32 1, %s1310_s26  }
  0x23   : > { %s1776_s15 = scalar_select %p1486_p4, 1, 0 }
  0x24   : > { %s1777_s18 = scalar_select %p1491_p5, 1, 0 }
  0x25   : > { %s941_s16 = sshll.u32 %s261_s12, 2  ;;  %s978_s19 = sshll.u32 %s1326_s30, 6 }
  0x26   : > { %s1500_s10 = scalar_lea.hbm %s1747_s0, %s978_s19  ;;  %s265_s8 = scalar_lea.vmem [#allocation5], %s941_s16 }
  0x27   : > { %s273_s9 = sshll.u32 %s265_s8, 4  ;;  %p1506_p6 = pnand %p1018_p2, %p1442_p3  ;;  %s1502_s9 = int_to_ptr.vmem [resolvable:$true] %s273_s9 }
  0x28   : > { %s1511_s30 = sadd.s32 %s1322_s29, %s978_s19  ;;  %p1515_p8 = pnand %p1018_p2, %p1470_p12 }
  0x29   : > { %s946_s16 = sshll.u32 %s1511_s30, 6  ;;  %s262_s14 = scalar_lea.sflag [#allocation6], %s261_s12 }
  0x2a   : > { %s1144_s8 = scalar_lea.hbm %s1500_s10, 64  ;;  %p1146_p10 = pneg %p1506_p6 }
  0x2b   : > { %p1145_p9 = scmp.ne.s32.totalorder %s1500_s10, %s1144_s8  ;;  %s1149_s19 = scalar_lea.hbm %s1747_s0, 128 }
  0x2c   : > { %p1150_p12 = scmp.lt.u32.totalorder %s1500_s10, %s1747_s0  ;;  %p1151_p0 = scmp.lt.u32.totalorder %s1149_s19, %s1144_s8 }
  0x2d   : > { %p1147_p3 = pnand %p1146_p10, %p1145_p9  ;;  %p1153_p2 = scmp.lt.u32.totalorder %s1144_s8, %s1500_s10 }
  0x2e   : > { %p1152_p1 = por %p1151_p0, %p1150_p12 }
  0x2f   : > { %p1148_p11 = pneg %p1147_p3 }
  0x30   : > { %p1154_p5 = por %p1153_p2, %p1152_p1 }
  0x32   : > { %p1155_p4 = pnand %p1154_p5, %p1148_p11 }
  0x34   : > { %1158 = shalt.err (!%p1155_p4)
}
  0x35   : > { %s1159_s12 = scalar_lea.vmem %s1502_s9, 64  ;;  %s1332_s26 = smov [#allocation5]  }
  0x36   : > { %p1160_p9 = scmp.ne.s32.totalorder %s1502_s9, %s1159_s12  ;;  %s1164_s13 = sshll.u32 %s1332_s26, 4  ;;  %s1165_s13 = int_to_ptr.vmem [resolvable:$false] %s1164_s13 }
  0x37   : > { %s1166_s29 = scalar_lea.vmem %s1165_s13, 128  ;;  %p1167_p7 = scmp.lt.s32.totalorder %s1502_s9, %s1165_s13 }
  0x38   : > { %p1162_p3 = pnand %p1160_p9, %p1146_p10  ;;  %p1168_p12 = scmp.lt.s32.totalorder %s1166_s29, %s1159_s12 }
  0x3a   : > { %p1163_p13 = pneg %p1162_p3  ;;  %p1169_p0 = por %p1168_p12, %p1167_p7 }
  0x3c   : > { %p1170_p1 = pnand %p1169_p0, %p1163_p13 }
  0x3e   : > { %1173 = shalt.err (!%p1170_p1)
}
  0x3f   : > { %1010 = dma.hbm_to_vmem [thread:$0]  (!%p1506_p6), %s1500_s10, 64, %s1502_s9, %s262_s14  }
  0x40   : > { %s1550_s20 = scalar_lea.hbm %s1748_s1, %s946_s16  ;;  %p947_p7 = scmp.ge.s32.totalorder %s1330_s7, 1 }
  0x41   : > { %p302_p13 = scmp.lt.s32.totalorder %s1330_s7, 5  ;;  %s280_s21 = sand.u32 1, %s1298_s23  }
  0x42   : > { %s944_s26 = sshll.u32 %s280_s21, 7  ;;  %s1561_s30 = scalar_lea.sflag [#allocation9], %s280_s21 }
  0x43   : > { %p1555_p4 = pnand %p947_p7, %p302_p13  ;;  %s284_s13 = scalar_lea.vmem [#allocation8], %s944_s26 }
  0x44   : > { %s294_s10 = sshll.u32 %s284_s13, 4  ;;  %s1174_s9 = scalar_lea.hbm %s1550_s20, 2048  ;;  %s1559_s10 = int_to_ptr.vmem [resolvable:$true] %s294_s10 }
  0x45   : > { %p1175_p5 = scmp.ne.s32.totalorder %s1550_s20, %s1174_s9  ;;  %p1176_p6 = pneg %p1515_p8 }
  0x46   : > { %s1179_s29 = scalar_lea.hbm %s1748_s1, 8192  ;;  %p1180_p2 = scmp.lt.u32.totalorder %s1550_s20, %s1748_s1 }
  0x47   : > { %p1177_p10 = pnand %p1176_p6, %p1175_p5  ;;  %p1181_p9 = scmp.lt.u32.totalorder %s1179_s29, %s1174_s9 }
  0x48   : > { %p1183_p12 = scmp.lt.u32.totalorder %s1174_s9, %s1550_s20 }
  0x49   : > { %p1178_p11 = pneg %p1177_p10  ;;  %p1182_p3 = por %p1181_p9, %p1180_p2 }
  0x4b   : > { %p1184_p0 = por %p1183_p12, %p1182_p3 }
  0x4d   : > { %p1185_p1 = pnand %p1184_p0, %p1178_p11 }
  0x4f   : > { %1188 = shalt.err (!%p1185_p1)
}
  0x50   : > { %s1189_s21 = scalar_lea.vmem %s1559_s10, 2048  ;;  %s1333_s26 = smov [#allocation8]  }
  0x51   : > { %p1190_p7 = scmp.ne.s32.totalorder %s1559_s10, %s1189_s21  ;;  %s1194_s13 = sshll.u32 %s1333_s26, 4  ;;  %s1195_s13 = int_to_ptr.vmem [resolvable:$false] %s1194_s13 }
  0x52   : > { %s1196_s16 = scalar_lea.vmem %s1195_s13, 4096  ;;  %p1197_p10 = scmp.lt.s32.totalorder %s1559_s10, %s1195_s13 }
  0x53   : > { %p1192_p13 = pnand %p1190_p7, %p1176_p6  ;;  %p1198_p2 = scmp.lt.s32.totalorder %s1196_s16, %s1189_s21 }
  0x55   : > { %p1193_p5 = pneg %p1192_p13  ;;  %p1199_p9 = por %p1198_p2, %p1197_p10 }
  0x57   : > { %p1200_p3 = pnand %p1199_p9, %p1193_p5 }
  0x59   : > { %1203 = shalt.err (!%p1200_p3)
}
  0x5a   : > { %s1334_s9 = smov 128   ;;  %s1335_s14 = smov 64  }
  0x5b   : > { %s1336_s29 = smov 4   ;;  %306 = sbr.rel (%p1555_p4) target bundleno = 944 (0x3b0), region = 32 }
  0x5c   : > { %1013 = dma.hbm_to_vmem [thread:$0]  (!%p1515_p8), %s1550_s20, 2048, %s1559_s10, %s1561_s30, %s1334_s9, %s1335_s14, %s1336_s29  }
  0x5d   : > { %s308_s8 = sand.u32 (!%p1555_p4), 1, %s1306_s25   ;;  %p1781_p6 = scmp.ne.s32.totalorder (!%p1555_p4), %s1771_s17, 0 }
  0x5e   : > { %s1592_s19 = sshll.u32 (!%p1555_p4), %s308_s8, 2  ;;  %s309_s21 = scalar_lea.sflag (!%p1555_p4), [#allocation6], %s308_s8 }
  0x62   : > { %1277 = dma.done.wait (%p1781_p6), %s309_s21, 64  }
  0x63   : > { %1279 = vsyncadd (%p1781_p6), %s309_s21, 4294967232  ;;  %s1600_s24 = sand.u32 1, %s1294_s22   ;;  %p1782_p8 = scmp.ne.s32.totalorder %s1775_s11, 0 }
  0x64   : > { %s949_s20 = sshll.u32 %s1600_s24, 7  ;;  %s318_s12 = scalar_lea.sflag [#allocation9], %s1600_s24 }
  0x65   : > { %s1604_s10 = scalar_lea.vmem [#allocation8], %s949_s20 }
  0x66   : > { %1281 = dma.done.wait (%p1782_p8), %s318_s12, 2048  }
  0x67   : > { %1283 = vsyncadd (%p1782_p8), %s318_s12, 4294965248  ;;  %s950_s17 = sshll.u32 %s1600_s24, 2  ;;  %p380_p4 = scmp.lt.s32.totalorder %s1318_s28, 1 }
  0x68   : > { %s1627_s26 = scalar_lea.vmem [#allocation10], %s950_s17  ;;  %p954_p11 = scmp.ne.s32.totalorder %s1314_s27, 0 }
  0x69   : > { %s381_s30 = scalar_select %p380_p4, %s1318_s28, 1 }
  0x6a   : > { %405 = sbr.rel (%p954_p11) target bundleno = 113 (0x71), region = 44  ;;  %vm406_vm0 = vcmask (!%p954_p11), 3072   ;;  %v1337_v0 = vmov (!%p954_p11), -inf   ;;  %v1338_v1 = vmov (!%p954_p11), 0.0  }
  0x6b   : > { %s1613_s13 = sshll.u32 %s381_s30, 2  ;;  %407 = vst.msk [vmem:[#allocation2] sm:$0xf] (!%p954_p11), %vm406_vm0, %v1337_v0  ;;  %408 = vst.msk [vmem:[#allocation3] sm:$0xf] (!%p954_p11), %vm406_vm0, %v1338_v1 }
  0x6c   : > { %s386_s14 = scalar_lea.vmem %s1751_s4, %s1613_s13  ;;  %s393_s11 = scalar_lea.vmem %s1752_s5, %s1613_s13  ;;  %409 = vst.msk [vmem:[#allocation4] sm:$0xf] (!%p954_p11), %vm406_vm0, %v1338_v1 }
  0x6d   : > { %s400_s12 = scalar_lea.vmem %s1753_s6, %s1613_s13 }
  0x71 PF: > { %v1116_v2 = vld [vmem:[%s1604_s10 + $0x40] sm:$0xff]   ;;  %v1339_v4 = vmov 0   ;;  %v1118_v5 = vld [vmem:[%s1604_s10 + $0x48] sm:$0xff]   ;;  %v1120_v7 = vld [vmem:[%s1604_s10 + $0x50] sm:$0xff]   ;;  %s1783_s17 = scalar_lea.vmem [#allocation5], %s1592_s19  ;;  %vm596_vm1 = vcmask 1043456  }
  0x72   : > { %v1117_v3 = vld [vmem:[%s1604_s10] sm:$0xff]   ;;  %1114 = vset.pattern.permute.xlu0 %v1339_v4  ;;  %1115 = vset.pattern.permute.xlu1 %v1339_v4  ;;  %v1119_v6 = vld [vmem:[%s1604_s10 + $0x8] sm:$0xff]   ;;  %v1121_v8 = vld [vmem:[%s1604_s10 + $0x10] sm:$0xff]   ;;  %vm659_vm2 = vcmask 3072   ;;  %p972_p12 = scmp.ne.s32.totalorder %s1314_s27, 1 }
  0x73   : > { %979 = vmatprep.subr.bf16.mxu0 %v1116_v2  ;;  %v1122_v9 = vld [vmem:[%s1604_s10 + $0x58] sm:$0xff]   ;;  %v1124_v11 = vld [vmem:[%s1604_s10 + $0x60] sm:$0xff]   ;;  %v1126_v13 = vld [vmem:[%s1604_s10 + $0x68] sm:$0xff]  }
  0x74   : > { %980 = vmatpush3.bf16.msra.mxu0 %v1117_v3  ;;  %v1123_v10 = vld [vmem:[%s1604_s10 + $0x18] sm:$0xff]   ;;  %v1125_v12 = vld [vmem:[%s1604_s10 + $0x20] sm:$0xff]   ;;  %v410_v15 = vld [vmem:[%s1749_s2] sm:$0xf] }
  0x75   : > { %981 = vmatprep.subr.bf16.mxu0 %v1118_v5  ;;  %v955_v14 = vld.sshfl [vmem:[%s1783_s17] sm:$0x33 pattern:$0x76325410]  ;;  %446 = vperm.xlu0 %1114, %v410_v15   ;;  %v1127_v17 = vld [vmem:[%s1604_s10 + $0x28] sm:$0xff]   ;;  %v1128_v18 = vld [vmem:[%s1604_s10 + $0x70] sm:$0xff]  }
  0x76   : > { %v457_v16 = vcombine.high %v955_v14, %v955_v14  ;;  %v1129_v19 = vld [vmem:[%s1604_s10 + $0x30] sm:$0xff]   ;;  %v1130_v20 = vld [vmem:[%s1604_s10 + $0x78] sm:$0xff]   ;;  %v637_v5 = vld [vmem:[#allocation2] sm:$0xf] }
  0x77   : > { %v1131_v21 = vld [vmem:[%s1604_s10 + $0x38] sm:$0xff]  }
  0x78   : > { %982 = vmatpush3.bf16.msra.mxu0 %v1119_v6  ;;  %588 = vmatprep.mubr.bf16.mxu0 %v457_v16 }
  0x79   : > { %983 = vmatprep.subr.bf16.mxu0 %v1120_v7 }
  0x7c   : > { %984 = vmatpush3.bf16.msra.mxu0 %v1121_v8 }
  0x7d   : > { %985 = vmatprep.subr.bf16.mxu0 %v1122_v9 }
  0x80   : > { %986 = vmatpush3.bf16.msra.mxu0 %v1123_v10 }
  0x81   : > { %987 = vmatprep.subr.bf16.mxu0 %v1124_v11 }
  0x84   : > { %988 = vmatpush3.bf16.msra.mxu0 %v1125_v12 }
  0x85   : > { %989 = vmatprep.subr.bf16.mxu0 %v1126_v13 }
  0x88   : > { %990 = vmatpush3.bf16.msra.mxu0 %v1127_v17 }
  0x89   : > { %991 = vmatprep.subr.bf16.mxu0 %v1128_v18 }
  0x8c   : > { %992 = vmatpush3.bf16.msra.mxu0 %v1129_v19  ;;  %v653_v19 = vld [vmem:[#allocation3] sm:$0xf] }
  0x8d   : > { %993 = vmatprep.subr.bf16.mxu0 %v1130_v20  ;;  %v661_v20 = vld [vmem:[#allocation4] sm:$0xf] }
  0x90   : > { %994 = vmatpush3.bf16.msra.mxu0 %v1131_v21 }
  0x93   : > { %589 = vmatmul.mubr.bf16.vlgmr.msra.gmra.mrb[0].mxu0 %v955_v14 }
  0xf4   : > { %v1651_v24 = vpop.permute.xlu0 %446 }
 0x166   : > { %v995_v22 = vpop.f32.mrb[0].mxu0 }
 0x167   : > { %v996_v23 = vpop.f32.mrb[1].mxu0 }
 0x168   : > { %v997_v25 = vadd.f32 %v996_v23, %v995_v22  ;;  %v998_v26 = vpop.f32.mrb[2].mxu0 }
 0x169   : > { %v999_v27 = vpop.f32.mrb[3].mxu0 }
 0x16a   : > { %v591_v28 = vadd.f32 %v997_v25, %v1651_v24 }
 0x16c   : > { %v597_v29 = vsel %vm596_vm1, %v591_v28, -inf  ;;  %v663_v12 = vsub.f32 %v591_v28, %v1651_v24 }
 0x16d   : > { %v598_v30 = vrot.slane %v597_v29, 4 }
 0x16f   : > { %v599_v31 = vmax.f32 %v597_v29, %v598_v30 }
 0x171   : > { %v600_v32 = vrot.slane %v599_v31, 2 }
 0x173   : > { %v601_v33 = vmax.f32 %v599_v31, %v600_v32 }
 0x175   : > { %v602_v34 = vrot.slane %v601_v33, 1 }
 0x177   : > { %v603_v35 = vmax.f32 %v601_v33, %v602_v34 }
 0x179   : > { %v604_v36 = vsub.f32 %v591_v28, %v603_v35 }
 0x17b   : > { %v605_v37 = vmul.f32 1.442695, %v604_v36 }
 0x17d   : > { %1132 = vpow2.f32 %v605_v37 }
 0x187   : > { %v1133_v38 = vpop.eup %1132 }
 0x188   : > { %v607_v39 = vsel %vm596_vm1, %v1133_v38, 0.0 }
 0x189   : > { %v608_v40 = vrot.slane %v607_v39, 4 }
 0x18b   : > { %v609_v41 = vadd.f32 %v608_v40, %v607_v39 }
 0x18d   : > { %v610_v42 = vrot.slane %v609_v41, 2 }
 0x18f   : > { %v611_v43 = vadd.f32 %v610_v42, %v609_v41 }
 0x191   : > { %v612_v44 = vrot.slane %v611_v43, 1 }
 0x193   : > { %v613_v45 = vadd.f32 %v612_v44, %v611_v43 }
 0x195   : > { %1134 = vrcp.f32 %v613_v45 }
 0x19f   : > { %v1135_v46 = vpop.eup %1134 }
 0x1a0   : > { %v615_v47 = vmul.f32 %v1135_v46, %v1133_v38 }
 0x1a2   : > { %v616_v48 = vsel %vm596_vm1, %v615_v47, -inf }
 0x1a3   : > { %v617_v49 = vrot.slane %v616_v48, 4 }
 0x1a5   : > { %v618_v50 = vmax.f32 %v616_v48, %v617_v49 }
 0x1a7   : > { %v619_v51 = vrot.slane %v618_v50, 2 }
 0x1a9   : > { %v620_v52 = vmax.f32 %v618_v50, %v619_v51 }
 0x1ab   : > { %v621_v53 = vrot.slane %v620_v52, 1 }
 0x1ad   : > { %v622_v54 = vmax.f32 %v620_v52, %v621_v53 }
 0x1af   : > { %v623_v55 = vsub.f32 %v615_v47, %v622_v54 }
 0x1b1   : > { %v624_v56 = vmul.f32 1.442695, %v623_v55 }
 0x1b3   : > { %1136 = vpow2.f32 %v624_v56 }
 0x1bd   : > { %v1137_v57 = vpop.eup %1136 }
 0x1be   : > { %v626_v58 = vsel %vm596_vm1, %v1137_v57, 0.0 }
 0x1bf   : > { %v627_v59 = vrot.slane %v626_v58, 4 }
 0x1c1   : > { %v628_v60 = vadd.f32 %v627_v59, %v626_v58 }
 0x1c3   : > { %v629_v61 = vrot.slane %v628_v60, 2 }
 0x1c5   : > { %v630_v62 = vadd.f32 %v629_v61, %v628_v60 }
 0x1c7   : > { %v631_v63 = vrot.slane %v630_v62, 1 }
 0x1c9   : > { %v632_v0 = vadd.f32 %v631_v63, %v630_v62 }
 0x1cb   : > { %1138 = vrcp.f32 %v632_v0 }
 0x1d5   : > { %v1139_v1 = vpop.eup %1138 }
 0x1d6   : > { %v634_v2 = vmul.f32 %v1139_v1, %v1137_v57 }
 0x1d8   : > { %v636_v3 = vmul.f32 148.41316, %v634_v2  ;;  %635 = vst [vmem:[%s1627_s26] sm:$0xf] %v634_v2 }
 0x1da   : > { %v638_v4 = vsel %vm596_vm1, %v636_v3, -inf }
 0x1db   : > { %639 = vmax.xlane.f32.xlu0 %v638_v4 }
 0x268   : > { %v640_v6 = vpop.xlane.xlu0 %639 }
 0x269   : > { %v641_v7 = vmax.f32 %v637_v5, %v640_v6 }
 0x26b   : > { %v642_v8 = vsub.f32 %v637_v5, %v641_v7  ;;  %670 = vst.msk [vmem:[#allocation2] sm:$0xf] %vm659_vm2, %v641_v7  ;;  %647 = vperm.xlu1 %1115, %v641_v7  }
 0x26d   : > { %v643_v17 = vmul.f32 1.442695, %v642_v8 }
 0x272   : > { %v675_v27 = vld [vmem:[#allocation2] sm:$0xf] (!%p972_p12) }
 0x273   : > { %676 = vst.msk [vmem:[%s386_s14] sm:$0xf] (!%p972_p12), %vm659_vm2, %v675_v27 }
 0x2ea   : > { %v648_v9 = vpop.permute.xlu1 %647 }
 0x2eb   : > { %v650_v10 = vsub.f32 %v636_v3, %v648_v9 }
 0x2ed   : > { %v651_v11 = vmul.f32 1.442695, %v650_v10 }
 0x2ef   : > { %1140 = vpow2.f32 %v651_v11 }
 0x2f0   : > { %1142 = vpow2.f32 %v643_v17 }
 0x2f9   : > { %v1141_v13 = vpop.eup %1140 }
 0x2fa   : > { %v655_v14 = vsel %vm596_vm1, %v1141_v13, 0.0  ;;  %v664_v15 = vmul.f32 %v1141_v13, %v663_v12  ;;  %v1143_v18 = vpop.eup %1142 }
 0x2fb   : > { %656 = vadd.xlane.f32.xlu1 %v655_v14  ;;  %v654_v21 = vmul.f32 %v1143_v18, %v653_v19  ;;  %v662_v25 = vmul.f32 %v1143_v18, %v661_v20 }
 0x2fc   : > { %v665_v16 = vsel %vm596_vm1, %v664_v15, 0.0 }
 0x2fd   : > { %666 = vadd.xlane.f32.xlu0 %v665_v16 }
 0x387   : > { %674 = sbr.rel (%p972_p12) target bundleno = 918 (0x396), region = 48 }
 0x388   : > { %v657_v22 = vpop.xlane.xlu1 %656 }
 0x389   : > { %v658_v23 = vadd.f32 %v657_v22, %v654_v21 }
 0x38a   : > { %v667_v26 = vpop.xlane.xlu0 %666 }
 0x38b   : > { %660 = vst.msk [vmem:[#allocation3] sm:$0xf] %vm659_vm2, %v658_v23  ;;  %v668_v24 = vadd.f32 %v667_v26, %v662_v25 }
 0x38d   : > { %669 = vst.msk [vmem:[#allocation4] sm:$0xf] %vm659_vm2, %v668_v24 }
 0x392   : > { %v677_v28 = vld [vmem:[#allocation3] sm:$0xf] }
 0x393   : > { %678 = vst.msk [vmem:[%s393_s11] sm:$0xf] %vm659_vm2, %v677_v28 }
 0x394   : > { %v679_v29 = vld [vmem:[#allocation4] sm:$0xf] }
 0x395   : > { %680 = vst.msk [vmem:[%s400_s12] sm:$0xf] %vm659_vm2, %v679_v29 }
 0x396 PF: > { %s974_s20 = sshll.u32 %s1318_s28, 1  ;;  %s720_s17 = sshll.u32 %s1627_s26, 4  ;;  %s1688_s17 = int_to_ptr.vmem [resolvable:$true] %s720_s17 }
 0x397   : > { %s716_s14 = sadd.s32 %s1314_s27, %s974_s20  ;;  %s682_s12 = scalar_lea.sflag [#allocation7], %s1600_s24 }
 0x398   : > { %s975_s30 = sshll.u32 %s716_s14, 6  ;;  %s1204_s19 = scalar_lea.vmem %s1688_s17, 64 }
 0x399   : > { %s718_s13 = scalar_lea.hbm %s1750_s3, %s975_s30  ;;  %p1205_p0 = scmp.ne.s32.totalorder %s1688_s17, %s1204_s19 }
 0x39a   : > { %p1784_p1 = scmp.ne.s32.totalorder %s1776_s15, 0  ;;  %s1340_s10 = smov [#allocation10]  }
 0x39b   : > { %s1208_s28 = sshll.u32 %s1340_s10, 4  ;;  %s1209_s28 = int_to_ptr.vmem [resolvable:$false] %s1208_s28 }
 0x39c   : > { %p1206_p7 = pnand %p1205_p0, %p1784_p1  ;;  %s1210_s27 = scalar_lea.vmem %s1209_s28, 128 }
 0x39d   : > { %p1211_p5 = scmp.lt.s32.totalorder %s1688_s17, %s1209_s28  ;;  %p1212_p10 = scmp.lt.s32.totalorder %s1210_s27, %s1204_s19 }
 0x39e   : > { %p1207_p13 = pneg %p1206_p7 }
 0x39f   : > { %p1213_p2 = por %p1212_p10, %p1211_p5 }
 0x3a1   : > { %p1214_p9 = pnand %p1213_p2, %p1207_p13 }
 0x3a3   : > { %1217 = shalt.err (!%p1214_p9)
}
 0x3a4   : > { %s1218_s26 = scalar_lea.hbm %s718_s13, 64  ;;  %s1222_s29 = scalar_lea.hbm %s1750_s3, 256 }
 0x3a5   : > { %p1219_p3 = scmp.ne.s32.totalorder %s718_s13, %s1218_s26  ;;  %p1223_p4 = scmp.lt.u32.totalorder %s718_s13, %s1750_s3 }
 0x3a6   : > { %p1224_p11 = scmp.lt.u32.totalorder %s1222_s29, %s1218_s26  ;;  %p1226_p0 = scmp.lt.u32.totalorder %s1218_s26, %s718_s13 }
 0x3a7   : > { %p1220_p6 = pnand %p1219_p3, %p1784_p1 }
 0x3a8   : > { %p1225_p12 = por %p1224_p11, %p1223_p4 }
 0x3a9   : > { %p1221_p8 = pneg %p1220_p6 }
 0x3aa   : > { %p1227_p7 = por %p1226_p0, %p1225_p12 }
 0x3ac   : > { %p1228_p13 = pnand %p1227_p7, %p1221_p8 }
 0x3ae   : > { %1231 = shalt.err (!%p1228_p13)
}
 0x3af   : > { %1005 = dma.vmem_to_hbm [thread:$0]  (%p1784_p1), %s1688_s17, 64, %s718_s13, %s682_s12  }
 0x3b0 PF: > { %s1785_s20 = sld [smem:[#allocation14_spill]]  ;;  %p1019_p5 = scmp.ge.s32.totalorder %s1330_s7, 2 }
 0x3b1   : > { %p1786_p10 = scmp.ne.s32.totalorder %s1777_s18, 0 }
 0x3b3   : > { %p1015_p2 = pnand %p1019_p5, %p1786_p10 }
 0x3b6   : > { %s741_s14 = sand.u32 1, %s1785_s20  }
 0x3b7   : > { %s742_s30 = scalar_lea.sflag [#allocation7], %s741_s14 }
 0x3b8   : > { %1285 = dma.done.wait (!%p1015_p2), %s742_s30, 64  }
 0x3b9   : > { %1287 = vsyncadd (!%p1015_p2), %s742_s30, 4294967232  ;;  %s26_s7 = sadd.s32 1, %s1330_s7   ;;  %s1787_s16 = sld [smem:[#allocation21_spill]] }
 0x3ba   : > { %p23_p9 = scmp.ge.s32.totalorder %s26_s7, 6   ;;  %s1788_s15 = sld [smem:[#allocation15_spill]] }
 0x3bb   : > { %s1789_s26 = sld [smem:[#allocation20_spill]]  ;;  %s1790_s27 = sld [smem:[#allocation16_spill]] }
 0x3bc   : > { %s1791_s28 = sld [smem:[#allocation17_spill]]  ;;  %s1792_s29 = sld [smem:[#allocation18_spill]] }
 0x3bd   : > { %s1793_s30 = sld [smem:[#allocation19_spill]]  ;;  %s1794_s21 = smov %s1294_s22 }
 0x3be   : > { %s1795_s22 = smov %s1298_s23  ;;  %s1797_s24 = smov %s1306_s25 }
 0x3bf   : > { %s1796_s23 = smov %s1787_s16  ;;  %25 = sbr.rel (!%p23_p9) target bundleno = 11 (0xb), region = 134 }
 0x3c0   : > { %s1798_s25 = smov %s1788_s15 }
 0x3c6   :  { %777 = vsyncpa [#allocation6], 1 }
 0x3c7   :  { %779 = vsyncpa [#allocation6 + $0x1], 1 }
 0x3c8   :  { %780 = vsyncpa [#allocation9], 1 }
 0x3c9   :  { %782 = vsyncpa [#allocation9 + $0x1], 1 }
 0x3ca   :  { %783 = vsyncpa [#allocation7], 1 }
 0x3cb   :  { %785 = vsyncpa [#allocation7 + $0x1], 1 }

</bundles_post_ra>
